<compile_context>
chip_gen: v5e
topology: v5e:2x2
jax: 0.10.0
libtpu: 0.0.40
codegen_flags: <defaults>
</compile_context>

<pallas_src>
import math
from functools import partial

import jax
import jax.numpy as jnp
from jax import lax
from jax.experimental import pallas as pl
from jax.experimental.pallas import tpu as pltpu

# ----------------------------- config (small, consistent with the module) ---
BATCH = 2
IN_CHANS = 4
IMG = 16                    # img_size = (16, 16)
PATCH = 7                   # patch_size
STRIDE = 4
EMBED_DIM = 32
GROUPNORM_DIVISOR = 8       # args.groupnorm_divisor (not given) -> pick 8
NUM_GROUPS = EMBED_DIM // GROUPNORM_DIVISOR
CPG = EMBED_DIM // NUM_GROUPS           # channels per group
EPS = 1e-5

PAD = PATCH // 2
H_OUT = (IMG + 2 * PAD - PATCH) // STRIDE + 1
W_OUT = (IMG + 2 * PAD - PATCH) // STRIDE + 1
N_TOK = H_OUT * W_OUT                    # spatial positions per sample
KDIM = IN_CHANS * PATCH * PATCH          # im2col feature size (196); full-extent
                                         # blocks, so no padding needed.


# ----------------------------- Pallas kernel --------------------------------
def patch_embed_kernel(patches_ref, w_ref, prm_ref, out_ref):
    """One grid step = a block of `bb` batch samples.

    patches_ref : (KDIM, bb*N_TOK)  im2col patches; K order = (C, kh, kw),
                                    column order = (sample, ho, wo).
    w_ref       : (E, KDIM)         flattened conv weight (same K order).
    prm_ref     : (E, 3)            col0 = conv bias, col1 = GN gamma, col2 = GN beta.
    out_ref     : (E, bb*N_TOK)     channel-major embedding; wrapper unpacks to
                                    the torch (B, E, N) flatten(2) layout.
    """
    bb = out_ref.shape[1] // N_TOK

    # Conv-as-matmul: ONE MXU call for the whole block of samples (f32 accum).
    y = jnp.dot(w_ref[...], patches_ref[...],
                preferred_element_type=jnp.float32)              # (E, bb*N) f32

    bias = prm_ref[:, 0:1]                                       # (E, 1) f32
    gamma = prm_ref[:, 1:2]
    beta = prm_ref[:, 2:3]
    y = y + bias                                                 # VPU bias add (f32)

    # GroupNorm per sample — VPU/XLU only, no MXU.  bb is a static Python int;
    # the per-sample views are static lane slices of the f32 accumulator, and
    # the (E,N)->(G,CPG,N) reshape is a sublane-tile aligned leading-dim split.
    inv_cnt = 1.0 / float(CPG * N_TOK)
    parts = []
    for b in range(bb):
        yb = y[:, b * N_TOK:(b + 1) * N_TOK]                     # (E, N)
        yg = yb.reshape(NUM_GROUPS, CPG, N_TOK)                  # (G, CPG, N)
        gsum = jnp.sum(jnp.sum(yg, axis=2, keepdims=True),
                       axis=1, keepdims=True)                    # (G, 1, 1)
        mean = gsum * inv_cnt
        yc = yg - mean
        ssq = jnp.sum(jnp.sum(yc * yc, axis=2, keepdims=True),
                      axis=1, keepdims=True)                     # (G, 1, 1)
        var = ssq * inv_cnt                                      # biased, as torch
        inv = lax.rsqrt(var + jnp.float32(EPS))
        yn = (yc * inv).reshape(EMBED_DIM, N_TOK)                # (E, N)
        parts.append(yn * gamma + beta)

    out_ref[...] = jnp.concatenate(parts, axis=1).astype(out_ref.dtype)


# ----------------------------- wrapper ---------------------------------------
def _im2col(x):
    """Exact patch extraction with static strided slices (no conv, no MXU work).

    Returns (KDIM, B*N_TOK); K order (C, kh, kw) matches conv_w.reshape(E, -1),
    columns are ordered (sample, ho, wo) — torch's flatten(2) order per sample.
    """
    B = x.shape[0]
    x_pad = jnp.pad(x, ((0, 0), (0, 0), (PAD, PAD), (PAD, PAD)))   # (B,C,Hp,Wp)
    lim_h = (H_OUT - 1) * STRIDE + 1
    lim_w = (W_OUT - 1) * STRIDE + 1
    rows = jnp.stack(
        [lax.slice_in_dim(x_pad, kh, kh + lim_h, STRIDE, axis=2)
         for kh in range(PATCH)], axis=2)                          # (B,C,kh,HO,Wp)
    cols = jnp.stack(
        [lax.slice_in_dim(rows, kw, kw + lim_w, STRIDE, axis=4)
         for kw in range(PATCH)], axis=3)                          # (B,C,kh,kw,HO,WO)
    return cols.transpose(1, 2, 3, 0, 4, 5).reshape(KDIM, B * N_TOK)


def _vmem_budget_bytes():
    try:
        return int(pltpu.get_tpu_info().vmem_capacity_bytes)
    except Exception:
        return 64 * 1024 * 1024          # conservative (v7x physical VMEM)


def _per_step_vmem_bytes(bb, in_itemsize):
    patches_blk = KDIM * bb * N_TOK * in_itemsize
    out_blk = EMBED_DIM * bb * N_TOK * 4
    w_blk = EMBED_DIM * KDIM * in_itemsize
    prm_blk = EMBED_DIM * 3 * 4
    # double-buffered pipelined blocks (ins + out) plus the resident weights
    return 2 * (patches_blk + out_blk) + 2 * (w_blk + prm_blk)


def _pick_block_batch(B, in_itemsize):
    """Largest per-step sample block that fits (half of) physical VMEM and keeps
    the lane dim of the block legal (full-extent or a multiple of 128)."""
    budget = _vmem_budget_bytes() // 2
    for bb in range(B, 0, -1):
        if B % bb:
            continue
        lane_ok = (bb == B) or ((bb * N_TOK) % 128 == 0)
        if lane_ok and _per_step_vmem_bytes(bb, in_itemsize) <= budget:
            return bb
    return 1


@partial(jax.jit, static_argnames=("use_bf16", "block_batch"))
def _embed(x, conv_w, conv_b, gn_w, gn_b, use_bf16=False, block_batch=None):
    B = x.shape[0]

    patches = _im2col(x.astype(jnp.float32))                       # (KDIM, B*N)
    w = conv_w.reshape(EMBED_DIM, KDIM).astype(jnp.float32)        # (E, KDIM)
    if use_bf16:
        # Production option: halves the dominant HBM stream; accumulation,
        # bias add and GroupNorm stay f32 inside the kernel.
        patches = patches.astype(jnp.bfloat16)
        w = w.astype(jnp.bfloat16)
    # Single tiny f32 operand for conv bias + GroupNorm affine.
    prm = jnp.stack([conv_b, gn_w, gn_b], axis=1).astype(jnp.float32)   # (E, 3)

    bb = _pick_block_batch(B, patches.dtype.itemsize) if block_batch is None \
        else block_batch
    assert B % bb == 0, (B, bb)

    need = _per_step_vmem_bytes(bb, patches.dtype.itemsize)
    vmem_limit = int(min(_vmem_budget_bytes() * 3 // 4,
                         max(4 * need, 16 * 1024 * 1024)))

    out = pl.pallas_call(
        patch_embed_kernel,
        out_shape=jax.ShapeDtypeStruct((EMBED_DIM, B * N_TOK), jnp.float32),
        grid_spec=pltpu.PrefetchScalarGridSpec(
            num_scalar_prefetch=0,
            grid=(B // bb,),
            in_specs=[
                pl.BlockSpec((KDIM, bb * N_TOK), lambda i: (0, i)),
                pl.BlockSpec((EMBED_DIM, KDIM), lambda i: (0, 0)),
                pl.BlockSpec((EMBED_DIM, 3), lambda i: (0, 0)),
            ],
            out_specs=pl.BlockSpec((EMBED_DIM, bb * N_TOK), lambda i: (0, i)),
        ),
        compiler_params=pltpu.CompilerParams(
            dimension_semantics=("parallel",),
            vmem_limit_bytes=vmem_limit),
    )(patches, w, prm)

    # (E, B*N) -> (B, E, N)  == torch's x.flatten(2) of the NCHW conv + GN.
    return out.reshape(EMBED_DIM, B, N_TOK).transpose(1, 0, 2)


def overlap_patch_embed(x, conv_w, conv_b, gn_w, gn_b, *, use_bf16=False,
                        block_batch=None):
    """x: (B, C, H, W) NCHW.  Returns ((B, E, H_out*W_out), H_out, W_out)."""
    out = _embed(x, conv_w, conv_b, gn_w, gn_b,
                 use_bf16=use_bf16, block_batch=block_batch)
    return out, H_OUT, W_OUT


# ----------------------------- pure-JAX reference ----------------------------
def reference(x, conv_w, conv_b, gn_w, gn_b):
    y = lax.conv_general_dilated(
        x, conv_w, window_strides=(STRIDE, STRIDE),
        padding=[(PAD, PAD), (PAD, PAD)],
        dimension_numbers=("NCHW", "OIHW", "NCHW"),
        precision=lax.Precision.HIGHEST)
    y = y + conv_b.reshape(1, EMBED_DIM, 1, 1)
    B, C, H, W = y.shape
    yg = y.reshape(B, NUM_GROUPS, CPG, H, W)
    mean = yg.mean(axis=(2, 3, 4), keepdims=True)
    var = yg.var(axis=(2, 3, 4), keepdims=True)
    yn = ((yg - mean) / jnp.sqrt(var + EPS)).reshape(B, C, H, W)
    yn = yn * gn_w.reshape(1, C, 1, 1) + gn_b.reshape(1, C, 1, 1)
    return yn.reshape(B, C, H * W), H, W


# ----------------------------- main -------------------------------------------
if __name__ == "__main__":
    key = jax.random.PRNGKey(0)
    k_x, k_w, k_b, k_g, k_bt = jax.random.split(key, 5)

    x = jax.random.normal(k_x, (BATCH, IN_CHANS, IMG, IMG), dtype=jnp.float32)

    # Module-faithful init: Conv2d weight ~ N(0, sqrt(2/fan_out)), bias = 0;
    # GroupNorm affine defaults (weight = 1, bias = 0).
    fan_out = PATCH * PATCH * EMBED_DIM
    conv_w = jax.random.normal(
        k_w, (EMBED_DIM, IN_CHANS, PATCH, PATCH), dtype=jnp.float32
    ) * math.sqrt(2.0 / fan_out)
    conv_b = jnp.zeros((EMBED_DIM,), jnp.float32)
    gn_w = jnp.ones((EMBED_DIM,), jnp.float32)
    gn_b = jnp.zeros((EMBED_DIM,), jnp.float32)

    out, H, W = overlap_patch_embed(x, conv_w, conv_b, gn_w, gn_b)
    out = jax.block_until_ready(out)

    ref, Hr, Wr = reference(x, conv_w, conv_b, gn_w, gn_b)
    assert (H, W) == (Hr, Wr)
    assert out.shape == (BATCH, EMBED_DIM, N_TOK)
    assert jnp.allclose(out, ref, atol=1e-4, rtol=1e-4), \
        float(jnp.max(jnp.abs(out - ref)))

    # Second check exercising the conv bias and the GroupNorm affine params.
    conv_b2 = 0.1 * jax.random.normal(k_b, (EMBED_DIM,), dtype=jnp.float32)
    gn_w2 = 1.0 + 0.1 * jax.random.normal(k_g, (EMBED_DIM,), dtype=jnp.float32)
    gn_b2 = 0.1 * jax.random.normal(k_bt, (EMBED_DIM,), dtype=jnp.float32)
    out2, _, _ = overlap_patch_embed(x, conv_w, conv_b2, gn_w2, gn_b2)
    out2 = jax.block_until_ready(out2)
    ref2, _, _ = reference(x, conv_w, conv_b2, gn_w2, gn_b2)
    assert jnp.allclose(out2, ref2, atol=1e-4, rtol=1e-4), \
        float(jnp.max(jnp.abs(out2 - ref2)))

    # bf16 production path: same kernel, bf16 operands, f32 accumulation/GN.
    out3, _, _ = overlap_patch_embed(x, conv_w, conv_b2, gn_w2, gn_b2,
                                     use_bf16=True)
    out3 = jax.block_until_ready(out3)
    assert out3.shape == (BATCH, EMBED_DIM, N_TOK)
    assert jnp.allclose(out3, ref2, atol=1e-1, rtol=1e-1), \
        float(jnp.max(jnp.abs(out3 - ref2)))

    print("KERNEL_OK")
</pallas_src>

<mosaic_0001>
module attributes {stable_mosaic.version = 11 : i64} {
  func.func @patch_embed_kernel(%arg0: i32, %arg1: memref<196x32xf32, #tpu.memory_space<vmem>>, %arg2: memref<32x196xf32, #tpu.memory_space<vmem>>, %arg3: memref<32x3xf32, #tpu.memory_space<vmem>>, %arg4: memref<32x32xf32, #tpu.memory_space<vmem>>) attributes {dimension_semantics = [#tpu.dimension_semantics<parallel>], iteration_bounds = array<i64: 1>, scalar_prefetch = 0 : i64, scratch_operands = 0 : i64, tpu.core_type = #tpu.core_type<tc>, window_params = [{transform_indices = @transform_0, window_bounds = array<i64: 196, 32>}, {pipeline_mode = #tpu.pipeline_mode<synchronous>, transform_indices = @transform_1, window_bounds = array<i64: 32, 196>}, {pipeline_mode = #tpu.pipeline_mode<synchronous>, transform_indices = @transform_2, window_bounds = array<i64: 32, 3>}, {transform_indices = @transform_3, window_bounds = array<i64: 32, 32>}]} {
    %c0 = arith.constant 0 : index
    %c0_0 = arith.constant 0 : index
    %0 = vector.load %arg2[%c0, %c0_0] : memref<32x196xf32, #tpu.memory_space<vmem>>, vector<32x196xf32>
    %c0_1 = arith.constant 0 : index
    %c0_2 = arith.constant 0 : index
    %1 = vector.load %arg1[%c0_1, %c0_2] : memref<196x32xf32, #tpu.memory_space<vmem>>, vector<196x32xf32>
    %cst = arith.constant dense<0.000000e+00> : vector<32x32xf32>
    %2 = tpu.matmul %0, %1, %cst {dimension_numbers = #tpu.dot_dimension_numbers<[1], [0], [0], [1], [0, 0, 1, 1], [], []>} : vector<32x196xf32>, vector<196x32xf32>, vector<32x32xf32> -> vector<32x32xf32>
    %c0_3 = arith.constant 0 : index
    %c0_4 = arith.constant 0 : index
    %3 = vector.load %arg3[%c0_3, %c0_4] : memref<32x3xf32, #tpu.memory_space<vmem>>, vector<32x1xf32>
    %c0_5 = arith.constant 0 : index
    %c1 = arith.constant 1 : index
    %4 = vector.load %arg3[%c0_5, %c1] : memref<32x3xf32, #tpu.memory_space<vmem>>, vector<32x1xf32>
    %c0_6 = arith.constant 0 : index
    %c2 = arith.constant 2 : index
    %5 = vector.load %arg3[%c0_6, %c2] : memref<32x3xf32, #tpu.memory_space<vmem>>, vector<32x1xf32>
    %6 = vector.broadcast %3 : vector<32x1xf32> to vector<32x32xf32>
    %7 = arith.addf %2, %6 : vector<32x32xf32>
    %8 = vector.extract_strided_slice %7 {offsets = [0, 0], sizes = [32, 16], strides = [1, 1]} : vector<32x32xf32> to vector<32x16xf32>
    %9 = vector.shape_cast %8 : vector<32x16xf32> to vector<4x8x16xf32>
    %cst_7 = arith.constant dense<0.000000e+00> : vector<4x8xf32>
    %10 = vector.multi_reduction <add>, %9, %cst_7 [2] : vector<4x8x16xf32> to vector<4x8xf32>
    %11 = vector.shape_cast %10 : vector<4x8xf32> to vector<4x8x1xf32>
    %cst_8 = arith.constant dense<0.000000e+00> : vector<4x1xf32>
    %12 = vector.multi_reduction <add>, %11, %cst_8 [1] : vector<4x8x1xf32> to vector<4x1xf32>
    %13 = vector.shape_cast %12 : vector<4x1xf32> to vector<4x1x1xf32>
    %cst_9 = arith.constant 7.812500e-03 : f32
    %14 = vector.broadcast %cst_9 : f32 to vector<4x1x1xf32>
    %15 = arith.mulf %13, %14 : vector<4x1x1xf32>
    %16 = vector.broadcast %15 : vector<4x1x1xf32> to vector<4x8x16xf32>
    %17 = arith.subf %9, %16 : vector<4x8x16xf32>
    %18 = arith.mulf %17, %17 : vector<4x8x16xf32>
    %cst_10 = arith.constant dense<0.000000e+00> : vector<4x8xf32>
    %19 = vector.multi_reduction <add>, %18, %cst_10 [2] : vector<4x8x16xf32> to vector<4x8xf32>
    %20 = vector.shape_cast %19 : vector<4x8xf32> to vector<4x8x1xf32>
    %cst_11 = arith.constant dense<0.000000e+00> : vector<4x1xf32>
    %21 = vector.multi_reduction <add>, %20, %cst_11 [1] : vector<4x8x1xf32> to vector<4x1xf32>
    %22 = vector.shape_cast %21 : vector<4x1xf32> to vector<4x1x1xf32>
    %cst_12 = arith.constant 7.812500e-03 : f32
    %23 = vector.broadcast %cst_12 : f32 to vector<4x1x1xf32>
    %24 = arith.mulf %22, %23 : vector<4x1x1xf32>
    %cst_13 = arith.constant 9.99999974E-6 : f32
    %25 = vector.broadcast %cst_13 : f32 to vector<4x1x1xf32>
    %26 = arith.addf %24, %25 : vector<4x1x1xf32>
    %27 = math.rsqrt %26 : vector<4x1x1xf32>
    %28 = vector.broadcast %27 : vector<4x1x1xf32> to vector<4x8x16xf32>
    %29 = arith.mulf %17, %28 : vector<4x8x16xf32>
    %30 = vector.shape_cast %29 : vector<4x8x16xf32> to vector<32x16xf32>
    %31 = vector.broadcast %4 : vector<32x1xf32> to vector<32x16xf32>
    %32 = arith.mulf %30, %31 : vector<32x16xf32>
    %33 = vector.broadcast %5 : vector<32x1xf32> to vector<32x16xf32>
    %34 = arith.addf %32, %33 : vector<32x16xf32>
    %35 = vector.extract_strided_slice %7 {offsets = [0, 16], sizes = [32, 16], strides = [1, 1]} : vector<32x32xf32> to vector<32x16xf32>
    %36 = vector.shape_cast %35 : vector<32x16xf32> to vector<4x8x16xf32>
    %cst_14 = arith.constant dense<0.000000e+00> : vector<4x8xf32>
    %37 = vector.multi_reduction <add>, %36, %cst_14 [2] : vector<4x8x16xf32> to vector<4x8xf32>
    %38 = vector.shape_cast %37 : vector<4x8xf32> to vector<4x8x1xf32>
    %cst_15 = arith.constant dense<0.000000e+00> : vector<4x1xf32>
    %39 = vector.multi_reduction <add>, %38, %cst_15 [1] : vector<4x8x1xf32> to vector<4x1xf32>
    %40 = vector.shape_cast %39 : vector<4x1xf32> to vector<4x1x1xf32>
    %cst_16 = arith.constant 7.812500e-03 : f32
    %41 = vector.broadcast %cst_16 : f32 to vector<4x1x1xf32>
    %42 = arith.mulf %40, %41 : vector<4x1x1xf32>
    %43 = vector.broadcast %42 : vector<4x1x1xf32> to vector<4x8x16xf32>
    %44 = arith.subf %36, %43 : vector<4x8x16xf32>
    %45 = arith.mulf %44, %44 : vector<4x8x16xf32>
    %cst_17 = arith.constant dense<0.000000e+00> : vector<4x8xf32>
    %46 = vector.multi_reduction <add>, %45, %cst_17 [2] : vector<4x8x16xf32> to vector<4x8xf32>
    %47 = vector.shape_cast %46 : vector<4x8xf32> to vector<4x8x1xf32>
    %cst_18 = arith.constant dense<0.000000e+00> : vector<4x1xf32>
    %48 = vector.multi_reduction <add>, %47, %cst_18 [1] : vector<4x8x1xf32> to vector<4x1xf32>
    %49 = vector.shape_cast %48 : vector<4x1xf32> to vector<4x1x1xf32>
    %cst_19 = arith.constant 7.812500e-03 : f32
    %50 = vector.broadcast %cst_19 : f32 to vector<4x1x1xf32>
    %51 = arith.mulf %49, %50 : vector<4x1x1xf32>
    %cst_20 = arith.constant 9.99999974E-6 : f32
    %52 = vector.broadcast %cst_20 : f32 to vector<4x1x1xf32>
    %53 = arith.addf %51, %52 : vector<4x1x1xf32>
    %54 = math.rsqrt %53 : vector<4x1x1xf32>
    %55 = vector.broadcast %54 : vector<4x1x1xf32> to vector<4x8x16xf32>
    %56 = arith.mulf %44, %55 : vector<4x8x16xf32>
    %57 = vector.shape_cast %56 : vector<4x8x16xf32> to vector<32x16xf32>
    %58 = vector.broadcast %4 : vector<32x1xf32> to vector<32x16xf32>
    %59 = arith.mulf %57, %58 : vector<32x16xf32>
    %60 = vector.broadcast %5 : vector<32x1xf32> to vector<32x16xf32>
    %61 = arith.addf %59, %60 : vector<32x16xf32>
    %62 = tpu.concatenate %34, %61 in 1 : vector<32x16xf32>, vector<32x16xf32> -> vector<32x32xf32>
    %c0_21 = arith.constant 0 : index
    %c0_22 = arith.constant 0 : index
    %63 = vector.load %arg4[%c0_21, %c0_22] : memref<32x32xf32, #tpu.memory_space<vmem>>, vector<32x32xf32>
    tpu.vector_store %arg4[%c0_21, %c0_22], %62 {strides = array<i32>} : memref<32x32xf32, #tpu.memory_space<vmem>>, vector<32x32xf32>,
    return
  }
  func.func @transform_0(%arg0: i32) -> (i32, i32) {
    %c0_i32 = arith.constant 0 : i32
    %c0_i32_0 = arith.constant 0 : i32
    return %c0_i32, %arg0 : i32, i32
  }
  func.func @transform_1(%arg0: i32) -> (i32, i32) {
    %c0_i32 = arith.constant 0 : i32
    %c0_i32_0 = arith.constant 0 : i32
    %c0_i32_1 = arith.constant 0 : i32
    return %c0_i32, %c0_i32_0 : i32, i32
  }
  func.func @transform_2(%arg0: i32) -> (i32, i32) {
    %c0_i32 = arith.constant 0 : i32
    %c0_i32_0 = arith.constant 0 : i32
    %c0_i32_1 = arith.constant 0 : i32
    return %c0_i32, %c0_i32_0 : i32, i32
  }
  func.func @transform_3(%arg0: i32) -> (i32, i32) {
    %c0_i32 = arith.constant 0 : i32
    %c0_i32_0 = arith.constant 0 : i32
    return %c0_i32, %arg0 : i32, i32
  }
}

</mosaic_0001>

<bundles_post_ra>
// kernel: _embed.1
= control target key start
LH: loop header
LB: loop body
LE: loop exit
PB: predicated region body
PF: predicated region fallthrough
CT: control target
= control target key end

     0   :  { %vm84_vm0 = vcmask 1043456   ;;  %vm71_vm1 = vcmask 556032   ;;  %v577_v23 = vmov 0   ;;  %vm146_vm2 = vcmask 130048   ;;  %s924_s0 = inlined_call_operand.vmem [shape: f32[196,32], index: 0, kind: input, shape index: {}]   ;;  %s925_s1 = inlined_call_operand.vmem [shape: f32[32,196], index: 1, kind: input, shape index: {}]   ;;  %s926_s2 = inlined_call_operand.vmem [shape: f32[32,3], index: 2, kind: input, shape index: {}]   ;;  %s927_s3 = inlined_call_operand.vmem [shape: f32[32,32], index: 3, kind: output, shape index: {}]  }
   0x1   :  { %v37_v0 = vld [vmem:[%s924_s0 + $0x78] sm:$0xff]  ;;  %v36_v1 = vld [vmem:[%s924_s0 + $0x70] sm:$0xff]  ;;  %v46_v2 = vld [vmem:[%s924_s0 + $0xc0] sm:$0xf]  ;;  %554 = vset.pattern.permute.xlu1 %v577_v23  ;;  %553 = vset.pattern.permute.xlu0 %v577_v23  ;;  %vm503_vm9 = vcmask 261120  }
   0x2   :  { %88 = vmatpush.msra.mxu0 %v37_v0  ;;  %517 = vmatpush.msra.mxu2 %v37_v0  ;;  %v35_v3 = vld [vmem:[%s924_s0 + $0x68] sm:$0xff]  ;;  %v45_v4 = vld [vmem:[%s924_s0 + $0xb8] sm:$0xff]  ;;  %v44_v5 = vld [vmem:[%s924_s0 + $0xb0] sm:$0xff] }
   0x3   :  { %518 = vmatpush.msra.mxu3 %v37_v0  ;;  %512 = vmatpush.msk.msra.mxu1 %vm84_vm0, %v46_v2  ;;  %v34_v6 = vld [vmem:[%s924_s0 + $0x60] sm:$0xff]  ;;  %v43_v7 = vld [vmem:[%s924_s0 + $0xa8] sm:$0xff]  ;;  %v33_v8 = vld [vmem:[%s924_s0 + $0x58] sm:$0xff] }
   0x4   :  { %89 = vmatpush.msra.mxu0 %v36_v1  ;;  %519 = vmatpush.msra.mxu2 %v36_v1  ;;  %v42_v9 = vld [vmem:[%s924_s0 + $0xa0] sm:$0xff]  ;;  %v32_v10 = vld [vmem:[%s924_s0 + $0x50] sm:$0xff]  ;;  %v41_v11 = vld [vmem:[%s924_s0 + $0x98] sm:$0xff] }
   0x5   :  { %520 = vmatpush.msra.mxu3 %v36_v1  ;;  %125 = vmatpush.msra.mxu1 %v45_v4  ;;  %v31_v12 = vld [vmem:[%s924_s0 + $0x48] sm:$0xff]  ;;  %v40_v13 = vld [vmem:[%s924_s0 + $0x90] sm:$0xff]  ;;  %v30_v14 = vld [vmem:[%s924_s0 + $0x40] sm:$0xff] }
   0x6   :  { %90 = vmatpush.msra.mxu0 %v35_v3  ;;  %521 = vmatpush.msra.mxu2 %v35_v3  ;;  %v39_v15 = vld [vmem:[%s924_s0 + $0x88] sm:$0xff]  ;;  %v29_v16 = vld [vmem:[%s924_s0 + $0x38] sm:$0xff]  ;;  %v38_v17 = vld [vmem:[%s924_s0 + $0x80] sm:$0xff] }
   0x7   :  { %522 = vmatpush.msra.mxu3 %v35_v3  ;;  %126 = vmatpush.msra.mxu1 %v44_v5  ;;  %v28_v18 = vld [vmem:[%s924_s0 + $0x30] sm:$0xff]  ;;  %v15_v19 = vld [vmem:[%s925_s1 + $0x8] sm:$0xff]  ;;  %v26_v21 = vld [vmem:[%s924_s0 + $0x20] sm:$0xff] }
   0x8   :  { %91 = vmatpush.msra.mxu0 %v34_v6  ;;  %523 = vmatpush.msra.mxu2 %v34_v6  ;;  %v27_v20 = vld [vmem:[%s924_s0 + $0x28] sm:$0xff]  ;;  %v25_v22 = vld [vmem:[%s924_s0 + $0x18] sm:$0xff]  ;;  %v674_v24 = vld [vmem:[%s926_s2 + $0x10] sm:$0xff] }
   0x9   :  { %524 = vmatpush.msra.mxu3 %v34_v6  ;;  %127 = vmatpush.msra.mxu1 %v43_v7  ;;  %v24_v25 = vld [vmem:[%s924_s0 + $0x10] sm:$0xff]  ;;  %v17_v26 = vld [vmem:[%s925_s1 + $0x18] sm:$0xff]  ;;  %v23_v27 = vld [vmem:[%s924_s0 + $0x8] sm:$0xff] }
   0xa   :  { %92 = vmatpush.msra.mxu0 %v33_v8  ;;  %525 = vmatpush.msra.mxu2 %v33_v8  ;;  %v689_v28 = vld [vmem:[%s926_s2] sm:$0xff]  ;;  %v16_v31 = vld [vmem:[%s925_s1 + $0x10] sm:$0xff]  ;;  %v708_v33 = vld [vmem:[%s926_s2 + $0x18] sm:$0xff] }
   0xb   :  { %526 = vmatpush.msra.mxu3 %v33_v8  ;;  %128 = vmatpush.msra.mxu1 %v42_v9  ;;  %v22_v29 = vld [vmem:[%s924_s0] sm:$0xff]  ;;  %v19_v34 = vld [vmem:[%s925_s1 + $0x28] sm:$0xff]  ;;  %v20_v36 = vld [vmem:[%s925_s1 + $0x30] sm:$0xff] }
   0xc   :  { %93 = vmatpush.msra.mxu0 %v32_v10  ;;  %527 = vmatpush.msra.mxu2 %v32_v10  ;;  %v14_v30 = vld [vmem:[%s925_s1] sm:$0xff]  ;;  %v717_v35 = vld [vmem:[%s926_s2 + $0x8] sm:$0xff]  ;;  %v21_v37 = vld [vmem:[%s925_s1 + $0x38] sm:$0xff]  ;;  %s578_s2 = smov 112  }
   0xd   :  { %528 = vmatpush.msra.mxu3 %v32_v10  ;;  %129 = vmatpush.msra.mxu1 %v41_v11  ;;  %v18_v32 = vld [vmem:[%s925_s1 + $0x20] sm:$0xff] }
   0xe   :  { %94 = vmatpush.msra.mxu0 %v31_v12  ;;  %529 = vmatpush.msra.mxu2 %v31_v12 }
   0xf   :  { %530 = vmatpush.msra.mxu3 %v31_v12  ;;  %130 = vmatpush.msra.mxu1 %v40_v13 }
  0x10   :  { %95 = vmatpush.msra.mxu0 %v30_v14  ;;  %531 = vmatpush.msra.mxu2 %v30_v14 }
  0x11   :  { %532 = vmatpush.msra.mxu3 %v30_v14  ;;  %131 = vmatpush.msra.mxu1 %v39_v15 }
  0x12   :  { %96 = vmatpush.msra.mxu0 %v29_v16  ;;  %533 = vmatpush.msra.mxu2 %v29_v16 }
  0x13   :  { %534 = vmatpush.msra.mxu3 %v29_v16  ;;  %132 = vmatpush.msra.mxu1 %v38_v17 }
  0x14   :  { %97 = vmatpush.msra.mxu0 %v28_v18  ;;  %535 = vmatpush.msra.mxu2 %v28_v18 }
  0x15   :  { %536 = vmatpush.msra.mxu3 %v28_v18  ;;  %513 = vmatmul.msk.f32.vlgmr.msra.gmra.mxu1 %vm71_vm1, %v15_v19 }
  0x16   :  { %98 = vmatpush.msra.mxu0 %v27_v20  ;;  %537 = vmatpush.msra.mxu2 %v27_v20 }
  0x17   :  { %538 = vmatpush.msra.mxu3 %v27_v20  ;;  %63 = vperm.xlu1 %554, %v674_v24  }
  0x18   :  { %99 = vmatpush.msra.mxu0 %v26_v21  ;;  %539 = vmatpush.msra.mxu2 %v26_v21 }
  0x19   :  { %540 = vmatpush.msra.mxu3 %v26_v21  ;;  %53 = vperm.xlu0 %553, %v689_v28  }
  0x1a   :  { %100 = vmatpush.msra.mxu0 %v25_v22  ;;  %541 = vmatpush.msra.mxu2 %v25_v22 }
  0x1b   :  { %542 = vmatpush.msra.mxu3 %v25_v22 }
  0x1c   :  { %101 = vmatpush.msra.mxu0 %v24_v25  ;;  %543 = vmatpush.msra.mxu2 %v24_v25 }
  0x1d   :  { %544 = vmatpush.msra.mxu3 %v24_v25  ;;  %514 = vmatmul.msk.f32.gmra.mxu1 %vm71_vm1, %v17_v26 }
  0x1e   :  { %102 = vmatpush.msra.mxu0 %v23_v27  ;;  %545 = vmatpush.msra.mxu2 %v23_v27 }
  0x1f   :  { %546 = vmatpush.msra.mxu3 %v23_v27  ;;  %68 = vperm.xlu1 %554, %v708_v33  }
  0x20   :  { %103 = vmatpush.msra.mxu0 %v22_v29  ;;  %547 = vmatpush.msra.mxu2 %v22_v29 }
  0x21   :  { %548 = vmatpush.msra.mxu3 %v22_v29  ;;  %104 = vmatmul.f32.vlgmr.msra.gmra.mxu0 %v14_v30 }
  0x22   :  { %107 = vmatmul.f32.vlgmr.msra.gmra.mxu2 %v16_v31  ;;  %110 = vmatmul.f32.vlgmr.msra.gmra.mxu3 %v18_v32 }
  0x23   :  { %58 = vperm.xlu0 %553, %v717_v35  }
  0x25   :  { %515 = vmatmul.msk.f32.gmra.mxu1 %vm71_vm1, %v19_v34 }
  0x2a   :  { %113 = vmatmul.f32.gmra.mxu3 %v20_v36 }
  0x2d   :  { %516 = vmatmul.msk.f32.gmra.mxu1 %vm71_vm1, %v21_v37 }
  0x89   :  { %v64_v44 = vpop.permute.xlu1 %63 }
  0x8b   :  { %v54_v39 = vpop.permute.xlu0 %53 }
  0x91   :  { %v69_v53 = vpop.permute.xlu1 %68 }
  0x92   :  { %v134_v38 = vpop.f32.mrf.mxu1 }
  0x95   :  { %v59_v45 = vpop.permute.xlu0 %58 }
  0x9a   :  { %v137_v40 = vpop.f32.mrf.mxu1 }
  0x9e   :  { %v105_v41 = vpop.f32.mrf.mxu0 }
  0x9f   :  { %v106_v42 = vadd.f32 %v105_v41, %v54_v39 }
  0xa1   :  { %v728_v43 = vadd.f32 %v134_v38, %v106_v42 }
  0xa2   :  { %v140_v46 = vpop.f32.mrf.mxu1 }
  0xa3   :  { %327 = vrot.lane.b32.xlu2 %v728_v43, %s578_s2  ;;  %v147_v58 = vsel %vm146_vm2, %v728_v43, 0.0 }
  0xa5   :  { %v108_v47 = vpop.f32.mrf.mxu2  ;;  %v111_v48 = vpop.f32.mrf.mxu3 }
  0xa6   :  { %v109_v49 = vadd.f32 %v108_v47, %v59_v45  ;;  %v112_v50 = vadd.f32 %v111_v48, %v64_v44 }
  0xa8   :  { %v732_v51 = vadd.f32 %v140_v46, %v112_v50  ;;  %v734_v52 = vadd.f32 %v137_v40, %v109_v49 }
  0xaa   :  { %331 = vrot.lane.b32.xlu0 %v732_v51, %s578_s2  ;;  %v143_v55 = vpop.f32.mrf.mxu1  ;;  %v153_v59 = vsel %vm146_vm2, %v732_v51, 0.0  ;;  %v150_v1 = vsel %vm146_vm2, %v734_v52, 0.0 }
  0xab   :  { %329 = vrot.lane.b32.xlu2 %v734_v52, %s578_s2 }
  0xad   :  { %v114_v54 = vpop.f32.mrf.mxu3 }
  0xae   :  { %v115_v56 = vadd.f32 %v114_v54, %v69_v53 }
  0xb0   :  { %v740_v57 = vadd.f32 %v143_v55, %v115_v56 }
  0xb2   :  { %333 = vrot.lane.b32.xlu1 %v740_v57, %s578_s2  ;;  %v156_v0 = vsel %vm146_vm2, %v740_v57, 0.0 }
  0xd4   :  { %148 = vadd.xlane.f32.xlu2 %v147_v58 }
  0xdc   :  { %154 = vadd.xlane.f32.xlu1 %v153_v59 }
  0xfd   :  { %v328_v60 = vpop.permute.xlu2 %327 }
  0xfe   :  { %v339_v61 = vsel %vm146_vm2, %v328_v60, 0.0 }
  0xff   :  { %340 = vadd.xlane.f32.xlu2 %v339_v61 }
 0x105   :  { %v330_v62 = vpop.permute.xlu2 %329 }
 0x106   :  { %v342_v63 = vsel %vm146_vm2, %v330_v62, 0.0 }
 0x107   :  { %343 = vadd.xlane.f32.xlu0 %v342_v63  ;;  %157 = vadd.xlane.f32.xlu2 %v156_v0 }
 0x10f   :  { %151 = vadd.xlane.f32.xlu0 %v150_v1 }
 0x11c   :  { %v332_v2 = vpop.permute.xlu0 %331 }
 0x11d   :  { %v345_v3 = vsel %vm146_vm2, %v332_v2, 0.0 }
 0x11e   :  { %346 = vadd.xlane.f32.xlu1 %v345_v3 }
 0x124   :  { %v334_v4 = vpop.permute.xlu1 %333 }
 0x125   :  { %v348_v5 = vsel %vm146_vm2, %v334_v4, 0.0 }
 0x126   :  { %349 = vadd.xlane.f32.xlu2 %v348_v5 }
 0x147   :  { %v149_v6 = vpop.xlane.xlu2 %148 }
 0x148   :  { %v159_v7 = vrot.slane %v149_v6, 4 }
 0x14a   :  { %v160_v8 = vadd.f32 %v159_v7, %v149_v6 }
 0x14c   :  { %v161_v9 = vrot.slane %v160_v8, 2 }
 0x14e   :  { %v162_v10 = vadd.f32 %v161_v9, %v160_v8 }
 0x14f   :  { %v155_v39 = vpop.xlane.xlu1 %154 }
 0x150   :  { %v163_v11 = vrot.slane %v162_v10, 1  ;;  %v171_v6 = vrot.slane %v155_v39, 4 }
 0x152   :  { %v164_v12 = vadd.f32 %v163_v11, %v162_v10  ;;  %v172_v10 = vadd.f32 %v171_v6, %v155_v39 }
 0x154   :  { %v183_v13 = vmul.f32 0.0078125, %v164_v12 }
 0x156   :  { %v757_v14 = vsub.f32 %v728_v43, %v183_v13  ;;  %v173_v13 = vrot.slane %v172_v10, 2 }
 0x158   :  { %v191_v15 = vmul.f32 %v757_v14, %v757_v14 }
 0x15a   :  { %v195_v16 = vsel %vm146_vm2, %v191_v15, 0.0 }
 0x15b   :  { %196 = vadd.xlane.f32.xlu1 %v195_v16 }
 0x172   :  { %v341_v17 = vpop.xlane.xlu2 %340 }
 0x173   :  { %v351_v18 = vrot.slane %v341_v17, 4 }
 0x175   :  { %v352_v19 = vadd.f32 %v351_v18, %v341_v17  ;;  %v174_v17 = vadd.f32 %v173_v13, %v172_v10 }
 0x177   :  { %v353_v20 = vrot.slane %v352_v19, 2 }
 0x179   :  { %v354_v21 = vadd.f32 %v353_v20, %v352_v19  ;;  %v579_v19 = vmov 1  }
 0x17a   :  { %v344_v22 = vpop.xlane.xlu0 %343  ;;  %v158_v42 = vpop.xlane.xlu2 %157  ;;  %556 = vset.pattern.permute.xlu1 %v579_v19  ;;  %555 = vset.pattern.permute.xlu2 %v579_v19 }
 0x17b   :  { %v355_v23 = vrot.slane %v354_v21, 1  ;;  %v357_v25 = vrot.slane %v344_v22, 4  ;;  %v177_v44 = vrot.slane %v158_v42, 4  ;;  %557 = vset.pattern.permute.xlu0 %v579_v19 }
 0x17d   :  { %v356_v26 = vadd.f32 %v355_v23, %v354_v21  ;;  %v358_v27 = vadd.f32 %v357_v25, %v344_v22  ;;  %v178_v47 = vadd.f32 %v177_v44, %v158_v42  ;;  %v175_v21 = vrot.slane %v174_v17, 1 }
 0x17f   :  { %v375_v29 = vmul.f32 0.0078125, %v356_v26  ;;  %v359_v30 = vrot.slane %v358_v27, 2  ;;  %v179_v53 = vrot.slane %v178_v47, 2  ;;  %v176_v23 = vadd.f32 %v175_v21, %v174_v17 }
 0x181   :  { %v360_v31 = vadd.f32 %v359_v30, %v358_v27  ;;  %v763_v32 = vsub.f32 %v728_v43, %v375_v29  ;;  %v180_v59 = vadd.f32 %v179_v53, %v178_v47 }
 0x182   :  { %v152_v11 = vpop.xlane.xlu0 %151 }
 0x183   :  { %v361_v34 = vrot.slane %v360_v31, 1  ;;  %v383_v36 = vmul.f32 %v763_v32, %v763_v32  ;;  %v181_v0 = vrot.slane %v180_v59, 1  ;;  %v165_v15 = vrot.slane %v152_v11, 4 }
 0x185   :  { %v362_v37 = vadd.f32 %v361_v34, %v360_v31  ;;  %391 = vrot.lane.b32.xlu0 %v383_v36, %s578_s2  ;;  %v182_v4 = vadd.f32 %v181_v0, %v180_v59  ;;  %v166_v18 = vadd.f32 %v165_v15, %v152_v11 }
 0x187   :  { %v376_v38 = vmul.f32 0.0078125, %v362_v37  ;;  %v186_v8 = vmul.f32 0.0078125, %v182_v4  ;;  %v167_v22 = vrot.slane %v166_v18, 2 }
 0x189   :  { %v769_v40 = vsub.f32 %v734_v52, %v376_v38  ;;  %v787_v12 = vsub.f32 %v740_v57, %v186_v8  ;;  %v168_v25 = vadd.f32 %v167_v22, %v166_v18 }
 0x18b   :  { %v384_v41 = vmul.f32 %v769_v40, %v769_v40  ;;  %v194_v16 = vmul.f32 %v787_v12, %v787_v12  ;;  %v169_v26 = vrot.slane %v168_v25, 1 }
 0x18d   :  { %393 = vrot.lane.b32.xlu1 %v384_v41, %s578_s2  ;;  %v204_v20 = vsel %vm146_vm2, %v194_v16, 0.0  ;;  %v170_v29 = vadd.f32 %v169_v26, %v168_v25 }
 0x18f   :  { %v184_v31 = vmul.f32 0.0078125, %v170_v29 }
 0x191   :  { %v347_v43 = vpop.xlane.xlu1 %346  ;;  %v799_v36 = vsub.f32 %v734_v52, %v184_v31 }
 0x192   :  { %v363_v45 = vrot.slane %v347_v43, 4 }
 0x193   :  { %v192_v37 = vmul.f32 %v799_v36, %v799_v36 }
 0x194   :  { %v364_v46 = vadd.f32 %v363_v45, %v347_v43 }
 0x195   :  { %v198_v38 = vsel %vm146_vm2, %v192_v37, 0.0 }
 0x196   :  { %v365_v48 = vrot.slane %v364_v46, 2 }
 0x198   :  { %v366_v49 = vadd.f32 %v365_v48, %v364_v46 }
 0x199   :  { %v350_v50 = vpop.xlane.xlu2 %349 }
 0x19a   :  { %v367_v54 = vrot.slane %v366_v49, 1  ;;  %v369_v55 = vrot.slane %v350_v50, 4 }
 0x19c   :  { %v368_v56 = vadd.f32 %v367_v54, %v366_v49  ;;  %v370_v58 = vadd.f32 %v369_v55, %v350_v50 }
 0x19e   :  { %v377_v60 = vmul.f32 0.0078125, %v368_v56  ;;  %v371_v61 = vrot.slane %v370_v58, 2 }
 0x1a0   :  { %v372_v62 = vadd.f32 %v371_v61, %v370_v58  ;;  %v775_v63 = vsub.f32 %v732_v51, %v377_v60 }
 0x1a2   :  { %v373_v1 = vrot.slane %v372_v62, 1  ;;  %v385_v2 = vmul.f32 %v775_v63, %v775_v63 }
 0x1a4   :  { %v374_v3 = vadd.f32 %v373_v1, %v372_v62  ;;  %395 = vrot.lane.b32.xlu2 %v385_v2, %s578_s2 }
 0x1a6   :  { %v378_v5 = vmul.f32 0.0078125, %v374_v3 }
 0x1a8   :  { %v781_v7 = vsub.f32 %v740_v57, %v378_v5  ;;  %v185_v57 = vmul.f32 0.0078125, %v176_v23 }
 0x1aa   :  { %v386_v9 = vmul.f32 %v781_v7, %v781_v7  ;;  %v793_v27 = vsub.f32 %v732_v51, %v185_v57  ;;  %v580_v51 = vmov 2  }
 0x1ac   :  { %397 = vrot.lane.b32.xlu0 %v386_v9, %s578_s2  ;;  %v193_v30 = vmul.f32 %v793_v27, %v793_v27 }
 0x1ae   :  { %v201_v34 = vsel %vm146_vm2, %v193_v30, 0.0 }
 0x1b7   :  { %205 = vadd.xlane.f32.xlu1 %v204_v20 }
 0x1cd   :  { %202 = vadd.xlane.f32.xlu2 %v201_v34 }
 0x1ce   :  { %v197_v43 = vpop.xlane.xlu1 %196 }
 0x1cf   :  { %v207_v48 = vrot.slane %v197_v43, 4 }
 0x1d0   :  { %288 = vperm.xlu1 %556, %v717_v35  }
 0x1d1   :  { %v208_v49 = vadd.f32 %v207_v48, %v197_v43 }
 0x1d3   :  { %v209_v50 = vrot.slane %v208_v49, 2 }
 0x1d6   :  { %199 = vadd.xlane.f32.xlu0 %v198_v38 }
 0x1d8   :  { %558 = vset.pattern.permute.xlu1 %v580_v51 }
 0x1e5   :  { %284 = vperm.xlu2 %555, %v689_v28  }
 0x1f7   :  { %v392_v39 = vpop.permute.xlu0 %391 }
 0x1f8   :  { %v403_v41 = vsel %vm146_vm2, %v392_v39, 0.0 }
 0x1f9   :  { %404 = vadd.xlane.f32.xlu0 %v403_v41 }
 0x1fe   :  { %v396_v42 = vpop.permute.xlu2 %395 }
 0x1ff   :  { %v409_v52 = vsel %vm146_vm2, %v396_v42, 0.0  ;;  %v394_v44 = vpop.permute.xlu1 %393 }
 0x200   :  { %410 = vadd.xlane.f32.xlu1 %v409_v52  ;;  %v406_v45 = vsel %vm146_vm2, %v394_v44, 0.0 }
 0x20e   :  { %407 = vadd.xlane.f32.xlu2 %v406_v45 }
 0x219   :  { %304 = vperm.xlu1 %558, %v689_v28   ;;  %v210_v28 = vadd.f32 %v209_v50, %v208_v49 }
 0x21b   :  { %v211_v53 = vrot.slane %v210_v28, 1 }
 0x21d   :  { %v212_v56 = vadd.f32 %v211_v53, %v210_v28 }
 0x21e   :  { %v398_v46 = vpop.permute.xlu0 %397 }
 0x21f   :  { %v412_v47 = vsel %vm146_vm2, %v398_v46, 0.0  ;;  %v231_v61 = vmul.f32 0.0078125, %v212_v56 }
 0x220   :  { %413 = vadd.xlane.f32.xlu0 %v412_v47 }
 0x221   :  { %312 = vperm.xlu1 %558, %v674_v24  }
 0x226   :  { %296 = vperm.xlu2 %555, %v708_v33  }
 0x22a   :  { %v206_v59 = vpop.xlane.xlu1 %205 }
 0x22b   :  { %v225_v15 = vrot.slane %v206_v59, 4 }
 0x22d   :  { %v226_v23 = vadd.f32 %v225_v15, %v206_v59 }
 0x22e   :  { %559 = vset.pattern.permute.xlu2 %v580_v51 }
 0x22f   :  { %308 = vperm.xlu2 %559, %v717_v35   ;;  %v816_v35 = vadd.f32 1e-05, %v231_v61  ;;  %v227_v38 = vrot.slane %v226_v23, 2 }
 0x231   :  { %561 = vrsqrt.f32 %v816_v35  ;;  %v228_v43 = vadd.f32 %v227_v38, %v226_v23  ;;  %vm245_vm4 = vweird.f32 %v816_v35 }
 0x233   :  { %v229_v28 = vrot.slane %v228_v43, 1 }
 0x234   :  { %292 = vperm.xlu0 %557, %v674_v24  }
 0x237   :  { %316 = vperm.xlu2 %559, %v708_v33   ;;  %v821_v13 = vpop.eup %561 }
 0x238   :  { %v240_v21 = vmul.f32 %v821_v13, %v816_v35  ;;  %vm246_vm3 = vweird.f32 %v821_v13 }
 0x239   :  { %vm842_vm5 = vmor %vm245_vm4, %vm246_vm3 }
 0x23a   :  { %v241_v34 = vmul.f32 %v821_v13, %v240_v21 }
 0x23c   :  { %560 = vset.pattern.permute.xlu0 %v580_v51  ;;  %v242_v52 = vmul.f32 0.5, %v241_v34 }
 0x23e   :  { %v243_v50 = vsub.f32 1.5, %v242_v52 }
 0x240   :  { %v203_v55 = vpop.xlane.xlu2 %202 }
 0x241   :  { %v219_v60 = vrot.slane %v203_v55, 4 }
 0x242   :  { %v818_v1 = vpop.permute.xlu1 %288 }
 0x243   :  { %v220_v0 = vadd.f32 %v219_v60, %v203_v55  ;;  %v230_v60 = vadd.f32 %v229_v28, %v228_v43 }
 0x245   :  { %v221_v33 = vrot.slane %v220_v0, 2 }
 0x247   :  { %v222_v6 = vadd.f32 %v221_v33, %v220_v0 }
 0x248   :  { %v285_v26 = vpop.permute.xlu2 %284 }
 0x249   :  { %v200_v54 = vpop.xlane.xlu0 %199  ;;  %v223_v16 = vrot.slane %v222_v6, 1 }
 0x24a   :  { %v213_v58 = vrot.slane %v200_v54, 4 }
 0x24b   :  { %v224_v25 = vadd.f32 %v223_v16, %v222_v6  ;;  %v234_v6 = vmul.f32 0.0078125, %v230_v60 }
 0x24c   :  { %v214_v62 = vadd.f32 %v213_v58, %v200_v54  ;;  %v244_v58 = vmul.f32 %v821_v13, %v243_v50 }
 0x24d   :  { %v233_v51 = vmul.f32 0.0078125, %v224_v25 }
 0x24e   :  { %v215_v24 = vrot.slane %v214_v62, 2 }
 0x24f   :  { %v828_v44 = vadd.f32 1e-05, %v233_v51 }
 0x250   :  { %v216_v4 = vadd.f32 %v215_v24, %v214_v62 }
 0x251   :  { %vm265_vm0 = vweird.f32 %v828_v44 }
 0x252   :  { %v217_v9 = vrot.slane %v216_v4, 1 }
 0x254   :  { %v218_v19 = vadd.f32 %v217_v9, %v216_v4  ;;  %v248_v4 = vsel %vm842_vm5, %v821_v13, %v244_v58 }
 0x255   :  { %v279_v16 = vmul.f32 %v248_v4, %v757_v14 }
 0x256   :  { %v232_v30 = vmul.f32 0.0078125, %v218_v19 }
 0x257   :  { %v299_v21 = vmul.f32 %v285_v26, %v279_v16 }
 0x258   :  { %v826_v41 = vadd.f32 1e-05, %v232_v30 }
 0x25a   :  { %vm255_vm11 = vweird.f32 %v826_v41 }
 0x26c   :  { %v405_v2 = vpop.xlane.xlu0 %404 }
 0x26d   :  { %v415_v3 = vrot.slane %v405_v2, 4 }
 0x26f   :  { %v416_v5 = vadd.f32 %v415_v3, %v405_v2 }
 0x271   :  { %v417_v8 = vrot.slane %v416_v5, 2 }
 0x273   :  { %v418_v10 = vadd.f32 %v417_v8, %v416_v5  ;;  %v411_v11 = vpop.xlane.xlu1 %410 }
 0x274   :  { %v427_v17 = vrot.slane %v411_v11, 4 }
 0x275   :  { %v419_v18 = vrot.slane %v418_v10, 1 }
 0x276   :  { %v428_v20 = vadd.f32 %v427_v17, %v411_v11 }
 0x277   :  { %v420_v22 = vadd.f32 %v419_v18, %v418_v10  ;;  %v860_v18 = vadd.f32 1e-05, %v234_v6 }
 0x278   :  { %v429_v57 = vrot.slane %v428_v20, 2 }
 0x279   :  { %v439_v29 = vmul.f32 0.0078125, %v420_v22 }
 0x27a   :  { %v430_v31 = vadd.f32 %v429_v57, %v428_v20 }
 0x27b   :  { %v443_v37 = vadd.f32 1e-05, %v439_v29 }
 0x27c   :  { %v431_v39 = vrot.slane %v430_v31, 1 }
 0x27d   :  { %563 = vrsqrt.f32 %v443_v37  ;;  %vm453_vm7 = vweird.f32 %v443_v37 }
 0x27e   :  { %v432_v42 = vadd.f32 %v431_v39, %v430_v31  ;;  %565 = vrsqrt.f32 %v826_v41 }
 0x27f   :  { %567 = vrsqrt.f32 %v828_v44 }
 0x280   :  { %v441_v45 = vmul.f32 0.0078125, %v432_v42 }
 0x281   :  { %v408_v46 = vpop.xlane.xlu2 %407 }
 0x282   :  { %v831_v47 = vadd.f32 1e-05, %v441_v45  ;;  %v421_v48 = vrot.slane %v408_v46, 4 }
 0x283   :  { %v564_v49 = vpop.eup %563 }
 0x284   :  { %v448_v53 = vmul.f32 %v564_v49, %v443_v37  ;;  %v422_v54 = vadd.f32 %v421_v48, %v408_v46  ;;  %569 = vrsqrt.f32 %v831_v47  ;;  %v837_v59 = vpop.eup %565  ;;  %vm454_vm6 = vweird.f32 %v564_v49 }
 0x285   :  { %v840_v0 = vpop.eup %567  ;;  %v250_v5 = vmul.f32 %v837_v59, %v826_v41  ;;  %vm455_vm8 = vmor %vm453_vm7, %vm454_vm6  ;;  %vm256_vm10 = vweird.f32 %v837_v59  ;;  %vm473_vm3 = vweird.f32 %v831_v47 }
 0x286   :  { %v449_v55 = vmul.f32 %v564_v49, %v448_v53  ;;  %v423_v56 = vrot.slane %v422_v54, 2  ;;  %v260_v9 = vmul.f32 %v840_v0, %v828_v44  ;;  %vm266_vm12 = vweird.f32 %v840_v0  ;;  %vm880_vm13 = vmor %vm255_vm11, %vm256_vm10 }
 0x287   :  { %v251_v13 = vmul.f32 %v837_v59, %v250_v5  ;;  %vm267_vm1 = vmor %vm265_vm0, %vm266_vm12 }
 0x288   :  { %v424_v61 = vadd.f32 %v423_v56, %v422_v54  ;;  %v450_v62 = vmul.f32 0.5, %v449_v55  ;;  %v261_v23 = vmul.f32 %v840_v0, %v260_v9 }
 0x289   :  { %v252_v57 = vmul.f32 0.5, %v251_v13  ;;  %v874_v50 = vpop.permute.xlu2 %296 }
 0x28a   :  { %v425_v33 = vrot.slane %v424_v61, 1  ;;  %v451_v2 = vsub.f32 1.5, %v450_v62  ;;  %v846_v3 = vpop.eup %569  ;;  %v262_v34 = vmul.f32 0.5, %v261_v23 }
 0x28b   :  { %v468_v10 = vmul.f32 %v846_v3, %v831_v47  ;;  %v305_v20 = vpop.permute.xlu1 %304  ;;  %v253_v38 = vsub.f32 1.5, %v252_v57  ;;  %vm474_vm14 = vweird.f32 %v846_v3 }
 0x28c   :  { %v426_v35 = vadd.f32 %v425_v33, %v424_v61  ;;  %v452_v8 = vmul.f32 %v564_v49, %v451_v2  ;;  %v319_v29 = vadd.f32 %v305_v20, %v299_v21  ;;  %v263_v45 = vsub.f32 1.5, %v262_v34  ;;  %vm475_vm5 = vmor %vm473_vm3, %vm474_vm14 }
 0x28d   :  { %v469_v25 = vmul.f32 %v846_v3, %v468_v10  ;;  %v254_v48 = vmul.f32 %v837_v59, %v253_v38 }
 0x28e   :  { %v440_v11 = vmul.f32 0.0078125, %v426_v35  ;;  %v456_v15 = vsel %vm455_vm8, %v564_v49, %v452_v8  ;;  %v264_v58 = vmul.f32 %v840_v0, %v263_v45  ;;  %vm275_vm8 = vweird.f32 %v860_v18 }
 0x28f   :  { %v487_v17 = vmul.f32 %v456_v15, %v763_v32  ;;  %v470_v37 = vmul.f32 0.5, %v469_v25  ;;  %v258_v61 = vsel %vm880_vm13, %v837_v59, %v254_v48 }
 0x290   :  { %v444_v19 = vadd.f32 1e-05, %v440_v11  ;;  %v280_v33 = vmul.f32 %v258_v61, %v799_v36  ;;  %v268_v4 = vsel %vm267_vm1, %v840_v0, %v264_v58 }
 0x291   :  { %v491_v22 = vmul.f32 %v487_v17, %v285_v26  ;;  %v471_v46 = vsub.f32 1.5, %v470_v37  ;;  %v309_v35 = vpop.permute.xlu2 %308  ;;  %v281_v47 = vmul.f32 %v268_v4, %v793_v27 }
 0x292   :  { %571 = vrsqrt.f32 %v444_v19  ;;  %vm463_vm4 = vweird.f32 %v444_v19  ;;  %v300_v9 = vmul.f32 %v818_v1, %v280_v33 }
 0x293   :  { %v495_v30 = vadd.f32 %v491_v22, %v305_v20  ;;  %v414_v14 = vpop.xlane.xlu0 %413  ;;  %573 = vrsqrt.f32 %v860_v18  ;;  %v472_v60 = vmul.f32 %v846_v3, %v471_v46  ;;  %v313_v11 = vpop.permute.xlu1 %312 }
 0x294   :  { %v433_v31 = vrot.slane %v414_v14, 4  ;;  %v320_v16 = vadd.f32 %v309_v35, %v300_v9 }
 0x295   :  { %v499_v32 = vsel %vm146_vm2, %v319_v29, %v495_v30  ;;  %v476_v5 = vsel %vm475_vm5, %v846_v3, %v472_v60 }
 0x296   :  { %504 = vst.msk [vmem:[%s927_s3] sm:$0xff] %vm503_vm9, %v499_v32  ;;  %v434_v26 = vadd.f32 %v433_v31, %v414_v14  ;;  %v489_v8 = vmul.f32 %v476_v5, %v775_v63 }
 0x298   :  { %v572_v51 = vpop.eup %571  ;;  %v435_v39 = vrot.slane %v434_v26, 2 }
 0x299   :  { %v458_v42 = vmul.f32 %v572_v51, %v444_v19  ;;  %v870_v52 = vpop.eup %573  ;;  %vm464_vm15 = vweird.f32 %v572_v51  ;;  %v317_v32 = vpop.permute.xlu2 %316 }
 0x29a   :  { %v436_v43 = vadd.f32 %v435_v39, %v434_v26  ;;  %v270_v53 = vmul.f32 %v870_v52, %v860_v18  ;;  %vm465_vm6 = vmor %vm463_vm4, %vm464_vm15  ;;  %vm276_vm7 = vweird.f32 %v870_v52 }
 0x29b   :  { %v459_v49 = vmul.f32 %v572_v51, %v458_v42  ;;  %vm277_vm11 = vmor %vm275_vm8, %vm276_vm7 }
 0x29c   :  { %v437_v28 = vrot.slane %v436_v43, 1  ;;  %v271_v59 = vmul.f32 %v870_v52, %v270_v53 }
 0x29d   :  { %v460_v54 = vmul.f32 0.5, %v459_v49 }
 0x29e   :  { %v438_v56 = vadd.f32 %v437_v28, %v436_v43  ;;  %v272_v0 = vmul.f32 0.5, %v271_v59 }
 0x29f   :  { %v461_v62 = vsub.f32 1.5, %v460_v54 }
 0x2a0   :  { %v442_v41 = vmul.f32 0.0078125, %v438_v56  ;;  %v273_v21 = vsub.f32 1.5, %v272_v0 }
 0x2a1   :  { %v462_v24 = vmul.f32 %v572_v51, %v461_v62 }
 0x2a2   :  { %v446_v2 = vadd.f32 1e-05, %v442_v41  ;;  %v274_v22 = vmul.f32 %v870_v52, %v273_v21 }
 0x2a3   :  { %v466_v6 = vsel %vm465_vm6, %v572_v51, %v462_v24 }
 0x2a4   :  { %v488_v44 = vmul.f32 %v466_v6, %v769_v40  ;;  %575 = vrsqrt.f32 %v446_v2  ;;  %v278_v57 = vsel %vm277_vm11, %v870_v52, %v274_v22  ;;  %vm483_vm12 = vweird.f32 %v446_v2 }
 0x2a5   :  { %v282_v14 = vmul.f32 %v278_v57, %v787_v12 }
 0x2a6   :  { %v492_v36 = vmul.f32 %v488_v44, %v818_v1  ;;  %v293_v10 = vpop.permute.xlu0 %292 }
 0x2a7   :  { %v301_v15 = vmul.f32 %v293_v10, %v281_v47  ;;  %v493_v3 = vmul.f32 %v489_v8, %v293_v10  ;;  %v302_v26 = vmul.f32 %v874_v50, %v282_v14 }
 0x2a8   :  { %v496_v13 = vadd.f32 %v492_v36, %v309_v35 }
 0x2a9   :  { %v321_v17 = vadd.f32 %v313_v11, %v301_v15  ;;  %v497_v19 = vadd.f32 %v493_v3, %v313_v11  ;;  %v322_v37 = vadd.f32 %v317_v32, %v302_v26 }
 0x2aa   :  { %v576_v40 = vpop.eup %575  ;;  %v500_v20 = vsel %vm146_vm2, %v320_v16, %v496_v13 }
 0x2ab   :  { %505 = vst.msk [vmem:[%s927_s3 + $0x8] sm:$0xff] %vm503_vm9, %v500_v20  ;;  %v478_v63 = vmul.f32 %v576_v40, %v446_v2  ;;  %v501_v27 = vsel %vm146_vm2, %v321_v17, %v497_v19  ;;  %vm484_vm10 = vweird.f32 %v576_v40 }
 0x2ac   :  { %506 = vst.msk [vmem:[%s927_s3 + $0x10] sm:$0xff] %vm503_vm9, %v501_v27  ;;  %vm485_vm13 = vmor %vm483_vm12, %vm484_vm10 }
 0x2ad   :  { %v479_v1 = vmul.f32 %v576_v40, %v478_v63 }
 0x2af   :  { %v480_v23 = vmul.f32 0.5, %v479_v1 }
 0x2b1   :  { %v481_v25 = vsub.f32 1.5, %v480_v23 }
 0x2b3   :  { %v482_v29 = vmul.f32 %v576_v40, %v481_v25 }
 0x2b5   :  { %v486_v30 = vsel %vm485_vm13, %v576_v40, %v482_v29 }
 0x2b6   :  { %v490_v31 = vmul.f32 %v486_v30, %v781_v7 }
 0x2b8   :  { %v494_v34 = vmul.f32 %v490_v31, %v874_v50 }
 0x2ba   :  { %v498_v18 = vadd.f32 %v494_v34, %v317_v32 }
 0x2bc   :  { %v502_v38 = vsel %vm146_vm2, %v322_v37, %v498_v18 }
 0x2bd   :  { %507 = vst.msk [vmem:[%s927_s3 + $0x18] sm:$0xff] %vm503_vm9, %v502_v38 }

</bundles_post_ra>
